<compile_context>
chip_gen: v6e
topology: v6e:2x2x1
jax: 0.10.0
libtpu: 0.0.40
codegen_flags: <defaults>
</compile_context>

<pallas_src>
import jax
import jax.numpy as jnp
from jax.experimental import pallas as pl
from jax.experimental.pallas import tpu as pltpu


def _round_up(x, m):
    return (x + m - 1) // m * m


def _tensorcores_per_chip():
    """Best-effort TensorCores-per-chip query (v7x has 2; v5e/v6e have 1)."""
    try:
        kind = jax.devices()[0].device_kind.lower()
    except Exception:
        return 1
    if "v7" in kind:
        return 2
    return 1


def _mixed_score_ff_kernel(d_ref, c_ref, w1_ref, w2_ref, ms1_ref, ms2_ref, x_sc):
    # d_ref, c_ref:     (h, tile_n)    VMEM  (batch dim squeezed by BlockSpec)
    # w1_ref:           (hid, 2h) bf16 VMEM, grid-resident  [dot cols | cost cols]
    # w2_ref:           (2h, hid) bf16 VMEM, grid-resident  [ms1 rows ; ms2 rows]
    # ms1_ref, ms2_ref: (h, tile_n)    VMEM
    # x_sc:             (2h, tile_n)   VMEM scratch (input dtype)
    h = d_ref.shape[0]

    # Stack dot/cost along the sublane axis so lin1 is a single MXU pass
    # with contraction dim 2h instead of two passes with K=h.
    x_sc[0:h, :] = d_ref[...]
    x_sc[h:2 * h, :] = c_ref[...]
    x = x_sc[...].astype(jnp.bfloat16)                       # (2h, tile_n)

    h1 = jnp.dot(w1_ref[...], x, preferred_element_type=jnp.float32)
    h1 = jnp.maximum(h1, 0.0).astype(jnp.bfloat16)           # (hid, tile_n) bf16

    # Single lin2 pass producing both outputs stacked on the sublane axis.
    out = jnp.dot(w2_ref[...], h1, preferred_element_type=jnp.float32)  # (2h, tile_n)
    ms1_ref[...] = out[0:h, :].astype(ms1_ref.dtype)
    ms2_ref[...] = out[h:2 * h, :].astype(ms2_ref.dtype)


def mixed_score_ff(dot_product_score, cost_mat_score, w1, w2, *, tile_n=8192):
    """Full module forward.

    dot_product_score, cost_mat_score: (b, h, r, c)
    w1: (h*ms_hidden, 2h)  -- lin1.weight
    w2: (2h, h*ms_hidden)  -- lin2.weight
    returns (ms1, ms2), each (b, h, r, c)
    """
    b, h, r, c = dot_product_score.shape
    hid, f_in = w1.shape
    assert f_in == 2 * h and w2.shape == (2 * h, hid)
    n_rc = r * c
    in_dtype = dot_product_score.dtype
    out_dtype = dot_product_score.dtype

    # Free reshapes: positions (r*c) land on the lane axis, no data movement.
    d = dot_product_score.reshape(b, h, n_rc)
    cm = cost_mat_score.reshape(b, h, n_rc)

    # One-time (trace-time) weight permutation + merge, so the kernel needs no
    # interleaving and only two MXU weight pushes per step:
    #   lin1 input feature index is (head*2 + score_kind)
    #   lin2 output feature index is (head*2 + which_output)
    w1_dot = w1[:, 0::2]                                   # (hid, h) acts on dot
    w1_cost = w1[:, 1::2]                                  # (hid, h) acts on cost
    w1_merged = jnp.concatenate([w1_dot, w1_cost], axis=1).astype(jnp.bfloat16)  # (hid, 2h)
    w2_ms1 = w2[0::2, :]                                   # (h, hid) produces ms1
    w2_ms2 = w2[1::2, :]                                   # (h, hid) produces ms2
    w2_merged = jnp.concatenate([w2_ms1, w2_ms2], axis=0).astype(jnp.bfloat16)   # (2h, hid)

    # Lane tile: multiple of 128 (or the full extent). No divisibility
    # requirement on n_rc: partial edge tiles get masked stores.
    if n_rc <= tile_n:
        tile_n = n_rc
    else:
        tile_n = max(128, (tile_n // 128) * 128)
    n_cores = _tensorcores_per_chip()
    if n_cores > 1 and b * pl.cdiv(n_rc, tile_n) < n_cores and n_rc > 128:
        # Only on dual-TensorCore chips (v7x): keep >= n_cores parallel steps,
        # splitting the lane extent as evenly as 128-granularity allows.
        tile_n = min(n_rc, _round_up(pl.cdiv(n_rc, n_cores), 128))
    grid = (b, pl.cdiv(n_rc, tile_n))

    io_spec = pl.BlockSpec((None, h, tile_n), lambda ib, it: (ib, 0, it))
    w1_spec = pl.BlockSpec((hid, 2 * h), lambda ib, it: (0, 0))
    w2_spec = pl.BlockSpec((2 * h, hid), lambda ib, it: (0, 0))

    ms1, ms2 = pl.pallas_call(
        _mixed_score_ff_kernel,
        out_shape=(jax.ShapeDtypeStruct((b, h, n_rc), out_dtype),
                   jax.ShapeDtypeStruct((b, h, n_rc), out_dtype)),
        grid_spec=pltpu.PrefetchScalarGridSpec(
            num_scalar_prefetch=0,
            grid=grid,
            in_specs=[io_spec, io_spec, w1_spec, w2_spec],
            out_specs=[io_spec, io_spec],
            scratch_shapes=[pltpu.VMEM((2 * h, tile_n), in_dtype)],
        ),
        compiler_params=pltpu.CompilerParams(
            dimension_semantics=("parallel", "parallel")),
    )(d, cm, w1_merged, w2_merged)

    return ms1.reshape(b, h, r, c), ms2.reshape(b, h, r, c)


def mixed_score_ff_ref(dot_product_score, cost_mat_score, w1, w2):
    """Plain-JAX f32 reference mirroring the PyTorch forward."""
    b, h, r, c = dot_product_score.shape
    two = jnp.stack((dot_product_score, cost_mat_score), axis=-1)
    two = jnp.transpose(two, (0, 2, 3, 1, 4)).reshape(b, r, c, 2 * h)
    h1 = jnp.maximum(two @ w1.T, 0.0)
    ms = h1 @ w2.T
    ms = ms.reshape(b, r, c, h, 2)
    ms = jnp.transpose(ms, (0, 3, 1, 2, 4))
    return ms[..., 0], ms[..., 1]


if __name__ == "__main__":
    # Small shapes consistent with the module.
    batch, num_heads, rows, cols = 2, 8, 16, 16
    ms_hidden_dim = 16  # hidden = num_heads * ms_hidden_dim = 128

    key = jax.random.PRNGKey(0)
    k_dot, k_cost, k_w1, k_w2 = jax.random.split(key, 4)

    dot_score = jax.random.normal(
        k_dot, (batch, num_heads, rows, cols), dtype=jnp.float32)
    cost_score = jax.random.normal(
        k_cost, (batch, num_heads, rows, cols), dtype=jnp.float32)

    # Deterministic parameter init (same shapes as nn.Linear weights, no bias).
    fan_in1 = 2 * num_heads
    fan_in2 = num_heads * ms_hidden_dim
    w1 = jax.random.uniform(
        k_w1, (num_heads * ms_hidden_dim, 2 * num_heads),
        minval=-1.0 / jnp.sqrt(fan_in1), maxval=1.0 / jnp.sqrt(fan_in1),
        dtype=jnp.float32)
    w2 = jax.random.uniform(
        k_w2, (2 * num_heads, num_heads * ms_hidden_dim),
        minval=-1.0 / jnp.sqrt(fan_in2), maxval=1.0 / jnp.sqrt(fan_in2),
        dtype=jnp.float32)

    ms1, ms2 = jax.jit(mixed_score_ff)(dot_score, cost_score, w1, w2)
    jax.block_until_ready((ms1, ms2))

    r1, r2 = mixed_score_ff_ref(dot_score, cost_score, w1, w2)
    assert ms1.shape == (batch, num_heads, rows, cols)
    assert ms2.shape == (batch, num_heads, rows, cols)
    # bf16 MXU operands with f32 accumulation: validate against the f32
    # reference with correspondingly loosened tolerances.
    assert jnp.allclose(ms1, r1, atol=3e-2, rtol=3e-2), \
        float(jnp.max(jnp.abs(ms1 - r1)))
    assert jnp.allclose(ms2, r2, atol=3e-2, rtol=3e-2), \
        float(jnp.max(jnp.abs(ms2 - r2)))

    print("KERNEL_OK")
</pallas_src>

<mosaic_0001>
module attributes {stable_mosaic.version = 11 : i64} {
  func.func @_mixed_score_ff_kernel(%arg0: i32, %arg1: i32, %arg2: memref<1x8x256xf32, #tpu.memory_space<vmem>>, %arg3: memref<1x8x256xf32, #tpu.memory_space<vmem>>, %arg4: memref<128x16xbf16, #tpu.memory_space<vmem>>, %arg5: memref<16x128xbf16, #tpu.memory_space<vmem>>, %arg6: memref<1x8x256xf32, #tpu.memory_space<vmem>>, %arg7: memref<1x8x256xf32, #tpu.memory_space<vmem>>, %arg8: memref<16x256xf32, #tpu.memory_space<vmem>>) attributes {dimension_semantics = [#tpu.dimension_semantics<parallel>, #tpu.dimension_semantics<parallel>], iteration_bounds = array<i64: 2, 1>, scalar_prefetch = 0 : i64, scratch_operands = 1 : i64, tpu.core_type = #tpu.core_type<tc>, window_params = [{transform_indices = @transform_0, window_bounds = array<i64: 1, 8, 256>}, {transform_indices = @transform_1, window_bounds = array<i64: 1, 8, 256>}, {pipeline_mode = #tpu.pipeline_mode<synchronous>, transform_indices = @transform_2, window_bounds = array<i64: 128, 16>}, {pipeline_mode = #tpu.pipeline_mode<synchronous>, transform_indices = @transform_3, window_bounds = array<i64: 16, 128>}, {transform_indices = @transform_4, window_bounds = array<i64: 1, 8, 256>}, {transform_indices = @transform_5, window_bounds = array<i64: 1, 8, 256>}]} {
    %c0 = arith.constant 0 : index
    %c0_0 = arith.constant 0 : index
    %c0_1 = arith.constant 0 : index
    %0 = vector.load %arg2[%c0, %c0_0, %c0_1] : memref<1x8x256xf32, #tpu.memory_space<vmem>>, vector<1x8x256xf32>
    %1 = vector.shape_cast %0 : vector<1x8x256xf32> to vector<8x256xf32>
    %c0_2 = arith.constant 0 : index
    %c0_3 = arith.constant 0 : index
    %2 = vector.load %arg8[%c0_2, %c0_3] : memref<16x256xf32, #tpu.memory_space<vmem>>, vector<8x256xf32>
    tpu.vector_store %arg8[%c0_2, %c0_3], %1 {strides = array<i32>} : memref<16x256xf32, #tpu.memory_space<vmem>>, vector<8x256xf32>,
    %c0_4 = arith.constant 0 : index
    %c0_5 = arith.constant 0 : index
    %c0_6 = arith.constant 0 : index
    %3 = vector.load %arg3[%c0_4, %c0_5, %c0_6] : memref<1x8x256xf32, #tpu.memory_space<vmem>>, vector<1x8x256xf32>
    %4 = vector.shape_cast %3 : vector<1x8x256xf32> to vector<8x256xf32>
    %c8 = arith.constant 8 : index
    %c0_7 = arith.constant 0 : index
    %5 = vector.load %arg8[%c8, %c0_7] : memref<16x256xf32, #tpu.memory_space<vmem>>, vector<8x256xf32>
    tpu.vector_store %arg8[%c8, %c0_7], %4 {strides = array<i32>} : memref<16x256xf32, #tpu.memory_space<vmem>>, vector<8x256xf32>,
    %c0_8 = arith.constant 0 : index
    %c0_9 = arith.constant 0 : index
    %6 = vector.load %arg8[%c0_8, %c0_9] : memref<16x256xf32, #tpu.memory_space<vmem>>, vector<16x256xf32>
    %7 = arith.truncf %6 : vector<16x256xf32> to vector<16x256xbf16>
    %c0_10 = arith.constant 0 : index
    %c0_11 = arith.constant 0 : index
    %8 = vector.load %arg4[%c0_10, %c0_11] : memref<128x16xbf16, #tpu.memory_space<vmem>>, vector<128x16xbf16>
    %cst = arith.constant dense<0.000000e+00> : vector<128x256xf32>
    %9 = tpu.matmul %8, %7, %cst {dimension_numbers = #tpu.dot_dimension_numbers<[1], [0], [0], [1], [0, 0, 1, 1], [], []>} : vector<128x16xbf16>, vector<16x256xbf16>, vector<128x256xf32> -> vector<128x256xf32>
    %cst_12 = arith.constant 0.000000e+00 : f32
    %10 = vector.broadcast %cst_12 : f32 to vector<128x256xf32>
    %11 = arith.maximumf %9, %10 : vector<128x256xf32>
    %12 = arith.truncf %11 : vector<128x256xf32> to vector<128x256xbf16>
    %c0_13 = arith.constant 0 : index
    %c0_14 = arith.constant 0 : index
    %13 = vector.load %arg5[%c0_13, %c0_14] : memref<16x128xbf16, #tpu.memory_space<vmem>>, vector<16x128xbf16>
    %cst_15 = arith.constant dense<0.000000e+00> : vector<16x256xf32>
    %14 = tpu.matmul %13, %12, %cst_15 {dimension_numbers = #tpu.dot_dimension_numbers<[1], [0], [0], [1], [0, 0, 1, 1], [], []>} : vector<16x128xbf16>, vector<128x256xbf16>, vector<16x256xf32> -> vector<16x256xf32>
    %15 = vector.extract_strided_slice %14 {offsets = [0, 0], sizes = [8, 256], strides = [1, 1]} : vector<16x256xf32> to vector<8x256xf32>
    %c0_16 = arith.constant 0 : index
    %c0_17 = arith.constant 0 : index
    %c0_18 = arith.constant 0 : index
    %16 = vector.load %arg6[%c0_16, %c0_17, %c0_18] : memref<1x8x256xf32, #tpu.memory_space<vmem>>, vector<1x8x256xf32>
    %17 = vector.shape_cast %16 : vector<1x8x256xf32> to vector<8x256xf32>
    %18 = vector.shape_cast %15 : vector<8x256xf32> to vector<1x8x256xf32>
    tpu.vector_store %arg6[%c0_16, %c0_17, %c0_18], %18 {strides = array<i32>} : memref<1x8x256xf32, #tpu.memory_space<vmem>>, vector<1x8x256xf32>,
    %19 = vector.extract_strided_slice %14 {offsets = [8, 0], sizes = [8, 256], strides = [1, 1]} : vector<16x256xf32> to vector<8x256xf32>
    %c0_19 = arith.constant 0 : index
    %c0_20 = arith.constant 0 : index
    %c0_21 = arith.constant 0 : index
    %20 = vector.load %arg7[%c0_19, %c0_20, %c0_21] : memref<1x8x256xf32, #tpu.memory_space<vmem>>, vector<1x8x256xf32>
    %21 = vector.shape_cast %20 : vector<1x8x256xf32> to vector<8x256xf32>
    %22 = vector.shape_cast %19 : vector<8x256xf32> to vector<1x8x256xf32>
    tpu.vector_store %arg7[%c0_19, %c0_20, %c0_21], %22 {strides = array<i32>} : memref<1x8x256xf32, #tpu.memory_space<vmem>>, vector<1x8x256xf32>,
    return
  }
  func.func @transform_0(%arg0: i32, %arg1: i32) -> (i32, i32, i32) {
    %c0_i32 = arith.constant 0 : i32
    %c0_i32_0 = arith.constant 0 : i32
    return %arg0, %c0_i32, %arg1 : i32, i32, i32
  }
  func.func @transform_1(%arg0: i32, %arg1: i32) -> (i32, i32, i32) {
    %c0_i32 = arith.constant 0 : i32
    %c0_i32_0 = arith.constant 0 : i32
    return %arg0, %c0_i32, %arg1 : i32, i32, i32
  }
  func.func @transform_2(%arg0: i32, %arg1: i32) -> (i32, i32) {
    %c0_i32 = arith.constant 0 : i32
    %c0_i32_0 = arith.constant 0 : i32
    %c0_i32_1 = arith.constant 0 : i32
    return %c0_i32, %c0_i32_0 : i32, i32
  }
  func.func @transform_3(%arg0: i32, %arg1: i32) -> (i32, i32) {
    %c0_i32 = arith.constant 0 : i32
    %c0_i32_0 = arith.constant 0 : i32
    %c0_i32_1 = arith.constant 0 : i32
    return %c0_i32, %c0_i32_0 : i32, i32
  }
  func.func @transform_4(%arg0: i32, %arg1: i32) -> (i32, i32, i32) {
    %c0_i32 = arith.constant 0 : i32
    %c0_i32_0 = arith.constant 0 : i32
    return %arg0, %c0_i32, %arg1 : i32, i32, i32
  }
  func.func @transform_5(%arg0: i32, %arg1: i32) -> (i32, i32, i32) {
    %c0_i32 = arith.constant 0 : i32
    %c0_i32_0 = arith.constant 0 : i32
    return %arg0, %c0_i32, %arg1 : i32, i32, i32
  }
}

</mosaic_0001>

<bundles_post_ra>
// kernel: mixed_score_ff.1
= control target key start
LH: loop header
LB: loop body
LE: loop exit
PB: predicated region body
PF: predicated region fallthrough
CT: control target
= control target key end

     0   :  { %s916_s18 = smov 0   ;;  %s918_s19 = smov 0   ;;  %s1020_s0 = inlined_call_operand.vmem [shape: f32[2,8,256], index: 0, kind: input, shape index: {}]   ;;  %s1021_s1 = inlined_call_operand.vmem [shape: f32[2,8,256], index: 1, kind: input, shape index: {}]   ;;  %s1022_s2 = inlined_call_operand.vmem [shape: bf16[128,16], index: 2, kind: input, shape index: {}]   ;;  %s1023_s3 = inlined_call_operand.vmem [shape: bf16[16,128], index: 3, kind: input, shape index: {}]   ;;  %s1024_s4 = inlined_call_operand.vmem [shape: f32[2,8,256], index: 4, kind: output, shape index: {0}]   ;;  %s1025_s5 = inlined_call_operand.vmem [shape: f32[2,8,256], index: 5, kind: output, shape index: {1}]  }
   0x1   :  { %s920_s20 = smov 0  }
   0x2 LB: > { %s28_s21 = sadd.s32 1, %s879_s19  ;;  %p795_p0 = scmp.ge.s32.totalorder %s883_s20, 1  ;;  %s883_s20 = sphi %s920_s20, %s16_s20   ;;  %s879_s19 = sphi %s918_s19, %s1027_s19   ;;  %s875_s18 = sphi %s916_s18, %s1026_s18  }
   0x3   : > { %p30_p1 = scmp.ge.s32.totalorder %s28_s21, 2  ;;  %p230_p2 = scmp.lt.s32.totalorder %s883_s20, 3 }
   0x5   : > { %s1029_s21 = smov (%p30_p1, %s28_s21), 0  ;;  %p231_p3 = pnand %p795_p0, %p230_p2 }
   0x6   : > { %p285_p4 = scmp.lt.s32.totalorder (!%p231_p3), %s875_s18, 1 }
   0x7   : > { %234 = sbr.rel (%p231_p3) target bundleno = 514 (0x202), region = 36 }
   0xc   : > { %v885_v0 = vmov 0   ;;  %s1031_s18 = smov (!%p285_p4, %s875_s18), 1  ;;  %v852_v7 = vld [vmem:[%s1022_s2] sm:$0xff]   ;;  %vm395_vm0 = vcmask 130048   ;;  %v853_v8 = vld [vmem:[%s1022_s2 + $0x8] sm:$0xff]   ;;  %v854_v9 = vld [vmem:[%s1022_s2 + $0x10] sm:$0xff]  }
   0xd   : > { %452 = vmatprep.mubr.bf16.mxu0 %v885_v0  ;;  %621 = vmatprep.mubr.bf16.mxu1 %v885_v0  ;;  %s934_s22 = sshll.u32 %s1031_s18, 4  ;;  %v855_v10 = vld [vmem:[%s1022_s2 + $0x18] sm:$0xff]   ;;  %v856_v11 = vld [vmem:[%s1022_s2 + $0x20] sm:$0xff]   ;;  %v857_v12 = vld [vmem:[%s1022_s2 + $0x28] sm:$0xff]  }
   0xe   : > { %s292_s25 = scalar_lea.vmem %s1020_s0, %s934_s22  ;;  %s302_s28 = scalar_lea.vmem %s1021_s1, %s934_s22  ;;  %v858_v13 = vld [vmem:[%s1022_s2 + $0x30] sm:$0xff]   ;;  %v859_v14 = vld [vmem:[%s1022_s2 + $0x38] sm:$0xff]  }
   0xf   : > { %v326_v1 = vld [vmem:[%s292_s25 + $0x8] sm:$0xff]  ;;  %v325_v3 = vld [vmem:[%s292_s25] sm:$0xff]  ;;  %s322_s6 = scalar_lea.vmem %s1025_s5, %s934_s22 }
  0x10   : > { %v330_v2 = vld [vmem:[%s302_s28 + $0x8] sm:$0xff]  ;;  %v329_v5 = vld [vmem:[%s302_s28] sm:$0xff]  ;;  %s312_s28 = scalar_lea.vmem %s1024_s4, %s934_s22 }
  0x11   : > { %v338_v4 = vpack.c.bf16 %v330_v2, %v326_v1  ;;  %v337_v6 = vpack.c.bf16 %v329_v5, %v325_v3 }
  0x13   : > { %434 = vmatprep.subr.bf16.mxu0 %v338_v4 }
  0x14   : > { %435 = vmatpush1.bf16.msra.mxu0 %v337_v6 }
  0x17   : > { %812 = vmatmul.mubr.msk.bf16.vlgmr.msra.gmra.mxu0 %vm395_vm0, %v852_v7 }
  0x18   : > { %462 = vmatprep.mubr.bf16.mxu0 %v885_v0 }
  0x1f   : > { %813 = vmatmul.mubr.msk.bf16.gmra.mxu0 %vm395_vm0, %v853_v8 }
  0x20   : > { %472 = vmatprep.mubr.bf16.mxu0 %v885_v0 }
  0x27   : > { %814 = vmatmul.mubr.msk.bf16.gmra.mxu0 %vm395_vm0, %v854_v9 }
  0x28   : > { %482 = vmatprep.mubr.bf16.mxu0 %v885_v0 }
  0x2f   : > { %815 = vmatmul.mubr.msk.bf16.gmra.mxu0 %vm395_vm0, %v855_v10 }
  0x30   : > { %492 = vmatprep.mubr.bf16.mxu0 %v885_v0 }
  0x37   : > { %816 = vmatmul.mubr.msk.bf16.gmra.mxu0 %vm395_vm0, %v856_v11 }
  0x38   : > { %502 = vmatprep.mubr.bf16.mxu0 %v885_v0 }
  0x3f   : > { %817 = vmatmul.mubr.msk.bf16.gmra.mxu0 %vm395_vm0, %v857_v12 }
  0x40   : > { %512 = vmatprep.mubr.bf16.mxu0 %v885_v0 }
  0x47   : > { %818 = vmatmul.mubr.msk.bf16.gmra.mxu0 %vm395_vm0, %v858_v13 }
  0x48   : > { %522 = vmatprep.mubr.bf16.mxu0 %v885_v0 }
  0x4f   : > { %819 = vmatmul.mubr.msk.bf16.gmra.mxu0 %vm395_vm0, %v859_v14 }
  0xd7   : > { %v454_v15 = vpop.f32.mrf.mxu0 }
  0xd8   : > { %v533_v18 = vmax.f32 %v454_v15, 0.0 }
  0xd9   : > { %v456_v16 = vpop.f32.mrf.mxu0 }
  0xda   : > { %v534_v21 = vmax.f32 %v456_v16, 0.0 }
  0xdb   : > { %v458_v17 = vpop.f32.mrf.mxu0 }
  0xdc   : > { %v535_v19 = vmax.f32 %v458_v17, 0.0 }
  0xdd   : > { %v460_v20 = vpop.f32.mrf.mxu0 }
  0xde   : > { %v976_v22 = vpack.c.bf16 %v535_v19, %v533_v18  ;;  %v536_v23 = vmax.f32 %v460_v20, 0.0 }
  0xdf   : > { %v464_v24 = vpop.f32.mrf.mxu0 }
  0xe0   : > { %v978_v25 = vpack.c.bf16 %v536_v23, %v534_v21  ;;  %v537_v28 = vmax.f32 %v464_v24, 0.0 }
  0xe1   : > { %v466_v26 = vpop.f32.mrf.mxu0 }
  0xe2   : > { %v538_v31 = vmax.f32 %v466_v26, 0.0 }
  0xe3   : > { %v468_v27 = vpop.f32.mrf.mxu0 }
  0xe4   : > { %v539_v29 = vmax.f32 %v468_v27, 0.0 }
  0xe5   : > { %v470_v30 = vpop.f32.mrf.mxu0 }
  0xe6   : > { %v980_v32 = vpack.c.bf16 %v539_v29, %v537_v28  ;;  %v540_v33 = vmax.f32 %v470_v30, 0.0 }
  0xe7   : > { %v982_v34 = vpop.f32.mrf.mxu0 }
  0xe8   : > { %v984_v35 = vpack.c.bf16 %v540_v33, %v538_v31  ;;  %v541_v31 = vmax.f32 %v982_v34, 0.0 }
  0xe9   : > { %v986_v36 = vpop.f32.mrf.mxu0 }
  0xea   : > { %v542_v27 = vmax.f32 %v986_v36, 0.0  ;;  %v860_v36 = vld [vmem:[%s1023_s3] sm:$0xff]  }
  0xeb   : > { %v988_v37 = vpop.f32.mrf.mxu0 }
  0xec   : > { %v543_v28 = vmax.f32 %v988_v37, 0.0 }
  0xed   : > { %v990_v38 = vpop.f32.mrf.mxu0 }
  0xee   : > { %v544_v23 = vmax.f32 %v990_v38, 0.0  ;;  %v569_v33 = vpack.c.bf16 %v543_v28, %v541_v31 }
  0xef   : > { %v484_v39 = vpop.f32.mrf.mxu0 }
  0xf0   : > { %v545_v26 = vmax.f32 %v484_v39, 0.0  ;;  %v570_v30 = vpack.c.bf16 %v544_v23, %v542_v27 }
  0xf1   : > { %v486_v40 = vpop.f32.mrf.mxu0 }
  0xf2   : > { %v546_v19 = vmax.f32 %v486_v40, 0.0 }
  0xf3   : > { %v488_v41 = vpop.f32.mrf.mxu0 }
  0xf4   : > { %v547_v20 = vmax.f32 %v488_v41, 0.0 }
  0xf5   : > { %v490_v42 = vpop.f32.mrf.mxu0 }
  0xf6   : > { %v548_v16 = vmax.f32 %v490_v42, 0.0  ;;  %v571_v29 = vpack.c.bf16 %v547_v20, %v545_v26 }
  0xf7   : > { %v494_v43 = vpop.f32.mrf.mxu0 }
  0xf8   : > { %v549_v18 = vmax.f32 %v494_v43, 0.0  ;;  %v572_v24 = vpack.c.bf16 %v548_v16, %v546_v19 }
  0xf9   : > { %v496_v44 = vpop.f32.mrf.mxu0 }
  0xfa   : > { %v550_v13 = vmax.f32 %v496_v44, 0.0 }
  0xfb   : > { %v498_v45 = vpop.f32.mrf.mxu0 }
  0xfc   : > { %v551_v14 = vmax.f32 %v498_v45, 0.0 }
  0xfd   : > { %v500_v46 = vpop.f32.mrf.mxu0 }
  0xfe   : > { %v552_v10 = vmax.f32 %v500_v46, 0.0  ;;  %v573_v21 = vpack.c.bf16 %v551_v14, %v549_v18 }
  0xff   : > { %v504_v47 = vpop.f32.mrf.mxu0 }
 0x100   : > { %v553_v12 = vmax.f32 %v504_v47, 0.0  ;;  %v574_v17 = vpack.c.bf16 %v552_v10, %v550_v13 }
 0x101   : > { %v506_v48 = vpop.f32.mrf.mxu0 }
 0x102   : > { %v554_v7 = vmax.f32 %v506_v48, 0.0 }
 0x103   : > { %v508_v49 = vpop.f32.mrf.mxu0 }
 0x104   : > { %v555_v8 = vmax.f32 %v508_v49, 0.0 }
 0x105   : > { %v510_v50 = vpop.f32.mrf.mxu0 }
 0x106   : > { %v556_v4 = vmax.f32 %v510_v50, 0.0  ;;  %v575_v15 = vpack.c.bf16 %v555_v8, %v553_v12 }
 0x107   : > { %v514_v51 = vpop.f32.mrf.mxu0 }
 0x108   : > { %v557_v6 = vmax.f32 %v514_v51, 0.0  ;;  %v576_v11 = vpack.c.bf16 %v556_v4, %v554_v7 }
 0x109   : > { %v516_v52 = vpop.f32.mrf.mxu0 }
 0x10a   : > { %v558_v0 = vmax.f32 %v516_v52, 0.0 }
 0x10b   : > { %v518_v53 = vpop.f32.mrf.mxu0 }
 0x10c   : > { %v559_v2 = vmax.f32 %v518_v53, 0.0 }
 0x10d   : > { %v520_v54 = vpop.f32.mrf.mxu0 }
 0x10e   : > { %v560_v60 = vmax.f32 %v520_v54, 0.0  ;;  %v577_v9 = vpack.c.bf16 %v559_v2, %v557_v6 }
 0x10f   : > { %v524_v55 = vpop.f32.mrf.mxu0 }
 0x110   : > { %v561_v63 = vmax.f32 %v524_v55, 0.0  ;;  %v578_v5 = vpack.c.bf16 %v560_v60, %v558_v0 }
 0x111   : > { %v526_v56 = vpop.f32.mrf.mxu0 }
 0x112   : > { %v562_v61 = vmax.f32 %v526_v56, 0.0 }
 0x113   : > { %v528_v57 = vpop.f32.mrf.mxu0 }
 0x114   : > { %v563_v58 = vmax.f32 %v528_v57, 0.0 }
 0x115   : > { %v530_v59 = vpop.f32.mrf.mxu0 }
 0x116   : > { %v564_v62 = vmax.f32 %v530_v59, 0.0  ;;  %v579_v3 = vpack.c.bf16 %v563_v58, %v561_v63 }
 0x118   : > { %v580_v1 = vpack.c.bf16 %v564_v62, %v562_v61 }
 0x11a   : > { %589 = vmatprep.subr.bf16.mxu1 %v580_v1 }
 0x11b   : > { %590 = vmatpush1.bf16.msra.mxu1 %v579_v3 }
 0x11c   : > { %591 = vmatprep.subr.bf16.mxu1 %v578_v5 }
 0x11f   : > { %592 = vmatpush1.bf16.msra.mxu1 %v577_v9 }
 0x120   : > { %593 = vmatprep.subr.bf16.mxu1 %v576_v11 }
 0x123   : > { %594 = vmatpush1.bf16.msra.mxu1 %v575_v15 }
 0x124   : > { %595 = vmatprep.subr.bf16.mxu1 %v574_v17 }
 0x127   : > { %596 = vmatpush1.bf16.msra.mxu1 %v573_v21 }
 0x128   : > { %597 = vmatprep.subr.bf16.mxu1 %v572_v24 }
 0x12b   : > { %598 = vmatpush1.bf16.msra.mxu1 %v571_v29 }
 0x12c   : > { %599 = vmatprep.subr.bf16.mxu1 %v570_v30 }
 0x12f   : > { %600 = vmatpush1.bf16.msra.mxu1 %v569_v33 }
 0x130   : > { %601 = vmatprep.subr.bf16.mxu1 %v984_v35 }
 0x133   : > { %602 = vmatpush1.bf16.msra.mxu1 %v980_v32 }
 0x134   : > { %603 = vmatprep.subr.bf16.mxu1 %v978_v25 }
 0x137   : > { %604 = vmatpush1.bf16.msra.mxu1 %v976_v22 }
 0x13a   : > { %622 = vmatmul.mubr.bf16.vlgmr.msra.gmra.mxu1 %v860_v36 }
 0x1fa   : > { %v623_v34 = vpop.f32.mrf.mxu1 }
 0x1fb   : > { %632 = vst [vmem:[%s312_s28] sm:$0xff] %v623_v34 }
 0x1fc   : > { %v625_v37 = vpop.f32.mrf.mxu1 }
 0x1fd   : > { %633 = vst [vmem:[%s312_s28 + $0x8] sm:$0xff] %v625_v37 }
 0x1fe   : > { %v627_v25 = vpop.f32.mrf.mxu1 }
 0x1ff   : > { %634 = vst [vmem:[%s322_s6] sm:$0xff] %v627_v25 }
 0x200   : > { %v629_v32 = vpop.f32.mrf.mxu1 }
 0x201   : > { %635 = vst [vmem:[%s322_s6 + $0x8] sm:$0xff] %v629_v32 }
 0x202 PF: > { %s16_s20 = sadd.s32 1, %s883_s20   ;;  %s1026_s18 = smov %s879_s19 }
 0x203   : > { %p13_p5 = scmp.ge.s32.totalorder %s16_s20, 4   ;;  %s1027_s19 = smov %s1029_s21 }
 0x205   :  { %15 = sbr.rel (!%p13_p5) target bundleno = 2 (0x2), region = 81 }

</bundles_post_ra>
